<compile_context>
chip_gen: v7x
topology: tpu7x:2x2x1
jax: 0.10.0
libtpu: 0.0.40
codegen_flags: <defaults>
</compile_context>

<pallas_src>
import functools

import numpy as np
import jax
import jax.numpy as jnp
from jax.experimental import pallas as pl
from jax.experimental.pallas import tpu as pltpu


def _round_up(a, b):
    return (a + b - 1) // b * b


# ----------------------------- kernel ----------------------------------------

def _splitmlp_kernel(x_ref, w_ref, b_ref, o_ref):
    # x_ref: (tm, K) bf16 | w_ref: (K, tn) bf16 | b_ref: (1, tn) f32 | o_ref: (tm, tn) f32
    acc = jnp.dot(x_ref[...], w_ref[...], preferred_element_type=jnp.float32)
    o_ref[...] = acc + b_ref[...]


# ----------------------------- wrapper ----------------------------------------

def split_mlp_forward(x, conv_w, conv_b, n_mlp):
    """Pallas forward of SplitMLP.

    x:      (n, d_inp)    float32
    conv_w: (d_out, 1, L) float32   (nn.Conv1d weight, groups=n_mlp, L = d_inp // n_mlp)
    conv_b: (d_out,)      float32
    """
    n, d_inp = x.shape
    d_out = conv_w.shape[0]
    L = d_inp // n_mlp
    og = d_out // n_mlp

    # Glue (plain XLA, one-time): fold the grouped conv into a block-diagonal weight.
    # W[g*L + l, g*og + o] = conv_w[g*og + o, 0, l]
    wg = conv_w.reshape(n_mlp, og, L)                       # (G, og, L)
    blocks = jnp.transpose(wg, (0, 2, 1))                   # (G, L, og)
    eye_g = jnp.eye(n_mlp, dtype=blocks.dtype)
    w_bd = (blocks[:, :, None, :] * eye_g[:, None, :, None]).reshape(d_inp, d_out)

    # Pad to lane-dense (multiple-of-128) feature dims and 8-aligned row tiles.
    k_pad = _round_up(d_inp, 128)
    d_out_pad = _round_up(d_out, 128)
    tm = min(256, _round_up(n, 8))
    n_pad = _round_up(n, tm)
    tn = next(c for c in (512, 256, 128) if d_out_pad % c == 0)

    # bf16 operands (single-pass MXU), f32 accumulation inside the kernel.
    x_p = jnp.zeros((n_pad, k_pad), jnp.bfloat16).at[:n, :d_inp].set(
        x.astype(jnp.bfloat16))
    w_p = jnp.zeros((k_pad, d_out_pad), jnp.bfloat16).at[:d_inp, :d_out].set(
        w_bd.astype(jnp.bfloat16))
    b_p = jnp.zeros((1, d_out_pad), jnp.float32).at[0, :d_out].set(
        conv_b.astype(jnp.float32))

    grid = (n_pad // tm, d_out_pad // tn)
    out = pl.pallas_call(
        _splitmlp_kernel,
        grid=grid,
        in_specs=[
            pl.BlockSpec((tm, k_pad), lambda i, j: (i, 0)),   # row tile, full K resident
            pl.BlockSpec((k_pad, tn), lambda i, j: (0, j)),   # out-col tile of the weight
            pl.BlockSpec((1, tn), lambda i, j: (0, j)),       # bias tile
        ],
        out_specs=pl.BlockSpec((tm, tn), lambda i, j: (i, j)),
        out_shape=jax.ShapeDtypeStruct((n_pad, d_out_pad), jnp.float32),
        compiler_params=pltpu.CompilerParams(
            dimension_semantics=("parallel", "parallel")),
    )(x_p, w_p, b_p)
    return out[:n, :d_out]


# ----------------------------- pure-JAX reference -----------------------------

def ref_split_mlp(x, conv_w, conv_b, n_mlp):
    n, d_inp = x.shape
    d_out = conv_w.shape[0]
    L = d_inp // n_mlp
    og = d_out // n_mlp
    xg = x.reshape(n, n_mlp, L)
    wg = conv_w.reshape(n_mlp, og, L)
    y = jnp.einsum("ngl,gol->ngo", xg, wg, precision=jax.lax.Precision.HIGHEST)
    y = y + conv_b.reshape(n_mlp, og)[None]
    return y.reshape(n, d_out)


# ----------------------------- main --------------------------------------------

if __name__ == "__main__":
    # DisenGCN-style SplitMLP shapes: n_mlp = ncaps = 7, d_inp = d_out = 7 * 32 = 224.
    n, n_mlp, nhidden = 64, 7, 32
    d_inp = d_out = n_mlp * nhidden
    L = d_inp // n_mlp

    key = jax.random.PRNGKey(0)
    kx, kw, kb = jax.random.split(key, 3)
    x = jax.random.normal(kx, (n, d_inp), dtype=jnp.float32)
    bound = 1.0 / float(np.sqrt(L))   # PyTorch Conv1d default init bound (fan_in = 1*L)
    conv_w = jax.random.uniform(kw, (d_out, 1, L), jnp.float32, -bound, bound)
    conv_b = jax.random.uniform(kb, (d_out,), jnp.float32, -bound, bound)

    fwd = jax.jit(functools.partial(split_mlp_forward, n_mlp=n_mlp))
    out = jax.block_until_ready(fwd(x, conv_w, conv_b))
    assert out.shape == (n, d_out)

    ref = ref_split_mlp(x, conv_w, conv_b, n_mlp)
    np.testing.assert_allclose(np.asarray(out), np.asarray(ref), rtol=2e-2, atol=2e-2)

    print("KERNEL_OK")
</pallas_src>

<mosaic_0001>
module attributes {stable_mosaic.version = 11 : i64} {
  func.func @_splitmlp_kernel(%arg0: i32, %arg1: i32, %arg2: memref<64x256xbf16, #tpu.memory_space<vmem>>, %arg3: memref<256x256xbf16, #tpu.memory_space<vmem>>, %arg4: memref<1x256xf32, #tpu.memory_space<vmem>>, %arg5: memref<64x256xf32, #tpu.memory_space<vmem>>) attributes {dimension_semantics = [#tpu.dimension_semantics<parallel>, #tpu.dimension_semantics<parallel>], iteration_bounds = array<i64: 1, 1>, scalar_prefetch = 0 : i64, scratch_operands = 0 : i64, tpu.core_type = #tpu.core_type<tc>, window_params = [{transform_indices = @transform_0, window_bounds = array<i64: 64, 256>}, {transform_indices = @transform_1, window_bounds = array<i64: 256, 256>}, {transform_indices = @transform_2, window_bounds = array<i64: 1, 256>}, {transform_indices = @transform_3, window_bounds = array<i64: 64, 256>}]} {
    %c0 = arith.constant 0 : index
    %c0_0 = arith.constant 0 : index
    %0 = vector.load %arg2[%c0, %c0_0] : memref<64x256xbf16, #tpu.memory_space<vmem>>, vector<64x256xbf16>
    %c0_1 = arith.constant 0 : index
    %c0_2 = arith.constant 0 : index
    %1 = vector.load %arg3[%c0_1, %c0_2] : memref<256x256xbf16, #tpu.memory_space<vmem>>, vector<256x256xbf16>
    %cst = arith.constant dense<0.000000e+00> : vector<64x256xf32>
    %2 = tpu.matmul %0, %1, %cst {dimension_numbers = #tpu.dot_dimension_numbers<[1], [0], [0], [1], [0, 0, 1, 1], [], []>} : vector<64x256xbf16>, vector<256x256xbf16>, vector<64x256xf32> -> vector<64x256xf32>
    %c0_3 = arith.constant 0 : index
    %c0_4 = arith.constant 0 : index
    %3 = vector.load %arg4[%c0_3, %c0_4] : memref<1x256xf32, #tpu.memory_space<vmem>>, vector<1x256xf32>
    %4 = vector.broadcast %3 : vector<1x256xf32> to vector<64x256xf32>
    %5 = arith.addf %2, %4 : vector<64x256xf32>
    %c0_5 = arith.constant 0 : index
    %c0_6 = arith.constant 0 : index
    %6 = vector.load %arg5[%c0_5, %c0_6] : memref<64x256xf32, #tpu.memory_space<vmem>>, vector<64x256xf32>
    tpu.vector_store %arg5[%c0_5, %c0_6], %5 {strides = array<i32>} : memref<64x256xf32, #tpu.memory_space<vmem>>, vector<64x256xf32>,
    return
  }
  func.func @transform_0(%arg0: i32, %arg1: i32) -> (i32, i32) {
    %c0_i32 = arith.constant 0 : i32
    %c0_i32_0 = arith.constant 0 : i32
    return %arg0, %c0_i32 : i32, i32
  }
  func.func @transform_1(%arg0: i32, %arg1: i32) -> (i32, i32) {
    %c0_i32 = arith.constant 0 : i32
    %c0_i32_0 = arith.constant 0 : i32
    return %c0_i32, %arg1 : i32, i32
  }
  func.func @transform_2(%arg0: i32, %arg1: i32) -> (i32, i32) {
    %c0_i32 = arith.constant 0 : i32
    %c0_i32_0 = arith.constant 0 : i32
    return %c0_i32, %arg1 : i32, i32
  }
  func.func @transform_3(%arg0: i32, %arg1: i32) -> (i32, i32) {
    %c0_i32 = arith.constant 0 : i32
    return %arg0, %arg1 : i32, i32
  }
}

</mosaic_0001>

<bundles_post_ra>
// kernel: split_mlp_forward.1
= control target key start
LH: loop header
LB: loop body
LE: loop exit
PB: predicated region body
PF: predicated region fallthrough
CT: control target
= control target key end

     0   :  { %s689_s0 = inlined_call_operand.vmem [shape: bf16[64,256], index: 0, kind: input, shape index: {}]   ;;  %s690_s1 = inlined_call_operand.vmem [shape: bf16[256,256], index: 1, kind: input, shape index: {}]   ;;  %s691_s2 = inlined_call_operand.vmem [shape: f32[1,256], index: 2, kind: input, shape index: {}]   ;;  %s692_s3 = inlined_call_operand.hbm [shape: f32[64,256], index: 3, kind: output, shape index: {}]  }
   0x1   :  { %v447_v0 = vld [vmem:[%s690_s1 + $0x4] ss:$8 sps:$4 sm:$0xff]   ;;  %v449_v1 = vld [vmem:[%s690_s1] ss:$8 sps:$4 sm:$0xff]   ;;  %v450_v2 = vld [vmem:[%s690_s1 + $0x14] ss:$8 sps:$4 sm:$0xff]  }
   0x2   :  { %267 = vmatprep.subr.bf16.mxu0 %v447_v0  ;;  %412 = vmatprep.subr.bf16.mxu1 %v447_v0  ;;  %v452_v3 = vld [vmem:[%s690_s1 + $0x10] ss:$8 sps:$4 sm:$0xff]   ;;  %v453_v4 = vld [vmem:[%s690_s1 + $0x24] ss:$8 sps:$4 sm:$0xff]   ;;  %v455_v5 = vld [vmem:[%s690_s1 + $0x20] ss:$8 sps:$4 sm:$0xff]  }
   0x3   :  { %268 = vmatpush1.bf16.msra.mxu0 %v449_v1  ;;  %428 = vmatpush1.bf16.msra.mxu1 %v449_v1  ;;  %v456_v6 = vld [vmem:[%s690_s1 + $0x34] ss:$8 sps:$4 sm:$0xff]   ;;  %v458_v7 = vld [vmem:[%s690_s1 + $0x30] ss:$8 sps:$4 sm:$0xff]   ;;  %v459_v8 = vld [vmem:[%s690_s1 + $0x44] ss:$8 sps:$4 sm:$0xff]  }
   0x4   :  { %269 = vmatprep.subr.bf16.mxu0 %v450_v2  ;;  %413 = vmatprep.subr.bf16.mxu1 %v450_v2  ;;  %v461_v9 = vld [vmem:[%s690_s1 + $0x40] ss:$8 sps:$4 sm:$0xff]   ;;  %v462_v10 = vld [vmem:[%s690_s1 + $0x54] ss:$8 sps:$4 sm:$0xff]   ;;  %v464_v11 = vld [vmem:[%s690_s1 + $0x50] ss:$8 sps:$4 sm:$0xff]  }
   0x5   :  { %v465_v12 = vld [vmem:[%s690_s1 + $0x64] ss:$8 sps:$4 sm:$0xff]   ;;  %v467_v14 = vld [vmem:[%s690_s1 + $0x60] ss:$8 sps:$4 sm:$0xff]   ;;  %v468_v16 = vld [vmem:[%s690_s1 + $0x74] ss:$8 sps:$4 sm:$0xff]  }
   0x6   :  { %v497_v13 = vld [vmem:[%s689_s0 + $0x4] ss:$8 sps:$4 sm:$0xff]   ;;  %v470_v17 = vld [vmem:[%s690_s1 + $0x70] ss:$8 sps:$4 sm:$0xff]  }
   0x7   :  { %270 = vmatpush1.bf16.msra.mxu0 %v452_v3  ;;  %429 = vmatpush1.bf16.msra.mxu1 %v452_v3  ;;  %v500_v15 = vld [vmem:[%s689_s0 + $0x24] ss:$8 sps:$4 sm:$0xff]  }
   0x8   :  { %271 = vmatprep.subr.bf16.mxu0 %v453_v4  ;;  %414 = vmatprep.subr.bf16.mxu1 %v453_v4 }
   0x9   :  { %299 = vmatprep.mubr.bf16.mxu0 %v497_v13  ;;  %319 = vmatprep.mubr.bf16.mxu1 %v500_v15 }
   0xb   :  { %272 = vmatpush1.bf16.msra.mxu0 %v455_v5  ;;  %430 = vmatpush1.bf16.msra.mxu1 %v455_v5 }
   0xc   :  { %273 = vmatprep.subr.bf16.mxu0 %v456_v6  ;;  %415 = vmatprep.subr.bf16.mxu1 %v456_v6 }
   0xf   :  { %274 = vmatpush1.bf16.msra.mxu0 %v458_v7  ;;  %431 = vmatpush1.bf16.msra.mxu1 %v458_v7 }
  0x10   :  { %275 = vmatprep.subr.bf16.mxu0 %v459_v8  ;;  %416 = vmatprep.subr.bf16.mxu1 %v459_v8 }
  0x13   :  { %276 = vmatpush1.bf16.msra.mxu0 %v461_v9  ;;  %432 = vmatpush1.bf16.msra.mxu1 %v461_v9 }
  0x14   :  { %277 = vmatprep.subr.bf16.mxu0 %v462_v10  ;;  %417 = vmatprep.subr.bf16.mxu1 %v462_v10 }
  0x17   :  { %278 = vmatpush1.bf16.msra.mxu0 %v464_v11  ;;  %433 = vmatpush1.bf16.msra.mxu1 %v464_v11 }
  0x18   :  { %279 = vmatprep.subr.bf16.mxu0 %v465_v12  ;;  %418 = vmatprep.subr.bf16.mxu1 %v465_v12 }
  0x1b   :  { %280 = vmatpush1.bf16.msra.mxu0 %v467_v14  ;;  %434 = vmatpush1.bf16.msra.mxu1 %v467_v14 }
  0x1c   :  { %8 = vsyncpa [#allocation3], 0  ;;  %281 = vmatprep.subr.bf16.mxu0 %v468_v16  ;;  %419 = vmatprep.subr.bf16.mxu1 %v468_v16  ;;  %v471_v18 = vld [vmem:[%s690_s1 + $0x84] ss:$8 sps:$4 sm:$0xff]   ;;  %v473_v19 = vld [vmem:[%s690_s1 + $0x80] ss:$8 sps:$4 sm:$0xff]   ;;  %v57_v40 = vlaneseq }
  0x1d   :  { %v474_v20 = vld [vmem:[%s690_s1 + $0x94] ss:$8 sps:$4 sm:$0xff]   ;;  %v476_v21 = vld [vmem:[%s690_s1 + $0x90] ss:$8 sps:$4 sm:$0xff]   ;;  %v477_v22 = vld [vmem:[%s690_s1 + $0xa4] ss:$8 sps:$4 sm:$0xff]  }
  0x1e   :  { %v479_v23 = vld [vmem:[%s690_s1 + $0xa0] ss:$8 sps:$4 sm:$0xff]   ;;  %v480_v24 = vld [vmem:[%s690_s1 + $0xb4] ss:$8 sps:$4 sm:$0xff]   ;;  %v482_v25 = vld [vmem:[%s690_s1 + $0xb0] ss:$8 sps:$4 sm:$0xff]  }
  0x1f   :  { %282 = vmatpush1.bf16.msra.mxu0 %v470_v17  ;;  %435 = vmatpush1.bf16.msra.mxu1 %v470_v17  ;;  %v483_v26 = vld [vmem:[%s690_s1 + $0xc4] ss:$8 sps:$4 sm:$0xff]   ;;  %v485_v27 = vld [vmem:[%s690_s1 + $0xc0] ss:$8 sps:$4 sm:$0xff]   ;;  %v486_v28 = vld [vmem:[%s690_s1 + $0xd4] ss:$8 sps:$4 sm:$0xff]  }
  0x20   :  { %283 = vmatprep.subr.bf16.mxu0 %v471_v18  ;;  %420 = vmatprep.subr.bf16.mxu1 %v471_v18  ;;  %v488_v29 = vld [vmem:[%s690_s1 + $0xd0] ss:$8 sps:$4 sm:$0xff]   ;;  %v489_v30 = vld [vmem:[%s690_s1 + $0xe4] ss:$8 sps:$4 sm:$0xff]   ;;  %v491_v31 = vld [vmem:[%s690_s1 + $0xe0] ss:$8 sps:$4 sm:$0xff]  }
  0x21   :  { %v492_v32 = vld [vmem:[%s690_s1 + $0xf4] ss:$8 sps:$4 sm:$0xff]   ;;  %v494_v33 = vld [vmem:[%s690_s1 + $0xf0] ss:$8 sps:$4 sm:$0xff]   ;;  %v495_v34 = vld [vmem:[%s689_s0] ss:$8 sps:$4 sm:$0xff]  }
  0x22   :  { %v498_v35 = vld [vmem:[%s689_s0 + $0x20] ss:$8 sps:$4 sm:$0xff]   ;;  %v501_v36 = vld [vmem:[%s689_s0 + $0x14] ss:$8 sps:$4 sm:$0xff]   ;;  %v505_v38 = vld [vmem:[%s689_s0 + $0x10] ss:$8 sps:$4 sm:$0xff]  }
  0x23   :  { %284 = vmatpush1.bf16.msra.mxu0 %v473_v19  ;;  %436 = vmatpush1.bf16.msra.mxu1 %v473_v19  ;;  %v503_v37 = vld [vmem:[%s689_s0 + $0x34] ss:$8 sps:$4 sm:$0xff]   ;;  %v506_v39 = vld [vmem:[%s689_s0 + $0x30] ss:$8 sps:$4 sm:$0xff]   ;;  %v58_v41 = vshrl.u32 %v57_v40, 7  ;;  %s531_s0 = smov [#allocation2]  }
  0x24   :  { %285 = vmatprep.subr.bf16.mxu0 %v474_v20  ;;  %421 = vmatprep.subr.bf16.mxu1 %v474_v20  ;;  %v55_v43 = vld [vmem:[%s691_s2] sm:$0x3]  ;;  %s361_s2 = sshll.u32 %s531_s0, 4  ;;  %s362_s2 = int_to_ptr.vmem [resolvable:$true] %s361_s2 }
  0x25   :  { %v59_v42 = vsub.s32 0, %v58_v41  ;;  %v63_v44 = vsub.s32 1, %v58_v41  ;;  %s507_s12 = scalar_lea.vmem %s362_s2, 2048  ;;  %p512_p1 = scmp.lt.s32.totalorder %s362_s2, %s362_s2 }
  0x26   :  { %p508_p0 = scmp.ne.s32.totalorder %s362_s2, %s507_s12  ;;  %p513_p2 = scmp.lt.s32.totalorder %s507_s12, %s507_s12 }
  0x27   :  { %286 = vmatpush1.bf16.msra.mxu0 %v476_v21  ;;  %437 = vmatpush1.bf16.msra.mxu1 %v476_v21  ;;  %v60_v45 = vrot.slane %v55_v43, %v59_v42  ;;  %v64_v46 = vrot.slane %v55_v43, %v63_v44 }
  0x28   :  { %287 = vmatprep.subr.bf16.mxu0 %v477_v22  ;;  %422 = vmatprep.subr.bf16.mxu1 %v477_v22  ;;  %p514_p3 = por %p513_p2, %p512_p1 }
  0x2a   :  { %p515_p4 = pnand %p514_p3, %p508_p0 }
  0x2b   :  { %288 = vmatpush1.bf16.msra.mxu0 %v479_v23  ;;  %438 = vmatpush1.bf16.msra.mxu1 %v479_v23 }
  0x2c   :  { %289 = vmatprep.subr.bf16.mxu0 %v480_v24  ;;  %423 = vmatprep.subr.bf16.mxu1 %v480_v24 }
  0x2f   :  { %290 = vmatpush1.bf16.msra.mxu0 %v482_v25  ;;  %439 = vmatpush1.bf16.msra.mxu1 %v482_v25 }
  0x30   :  { %291 = vmatprep.subr.bf16.mxu0 %v483_v26  ;;  %424 = vmatprep.subr.bf16.mxu1 %v483_v26 }
  0x33   :  { %292 = vmatpush1.bf16.msra.mxu0 %v485_v27  ;;  %440 = vmatpush1.bf16.msra.mxu1 %v485_v27 }
  0x34   :  { %293 = vmatprep.subr.bf16.mxu0 %v486_v28  ;;  %425 = vmatprep.subr.bf16.mxu1 %v486_v28 }
  0x37   :  { %294 = vmatpush1.bf16.msra.mxu0 %v488_v29  ;;  %441 = vmatpush1.bf16.msra.mxu1 %v488_v29 }
  0x38   :  { %295 = vmatprep.subr.bf16.mxu0 %v489_v30  ;;  %426 = vmatprep.subr.bf16.mxu1 %v489_v30 }
  0x3b   :  { %296 = vmatpush1.bf16.msra.mxu0 %v491_v31  ;;  %442 = vmatpush1.bf16.msra.mxu1 %v491_v31 }
  0x3c   :  { %297 = vmatprep.subr.bf16.mxu0 %v492_v32  ;;  %427 = vmatprep.subr.bf16.mxu1 %v492_v32 }
  0x3f   :  { %298 = vmatpush1.bf16.msra.mxu0 %v494_v33  ;;  %443 = vmatpush1.bf16.msra.mxu1 %v494_v33 }
  0x42   :  { %300 = vmatmul.mubr.bf16.vlgmr.msra.gmra.mrb[0].mxu0 %v495_v34  ;;  %320 = vmatmul.mubr.bf16.vlgmr.msra.gmra.mrb[0].mxu1 %v498_v35 }
  0x43   :  { %309 = vmatprep.mubr.bf16.mxu0 %v501_v36  ;;  %329 = vmatprep.mubr.bf16.mxu1 %v503_v37 }
  0x4a   :  { %310 = vmatmul.mubr.bf16.gmra.mrb[4].mxu0 %v505_v38  ;;  %330 = vmatmul.mubr.bf16.gmra.mrb[4].mxu1 %v506_v39 }
 0x115   :  { %v301_v47 = vpop.f32.mrb[0].mxu0  ;;  %v321_v48 = vpop.f32.mrb[0].mxu1 }
 0x116   :  { %v302_v49 = vadd.f32 %v301_v47, %v60_v45  ;;  %v322_v50 = vadd.f32 %v321_v48, %v60_v45  ;;  %v303_v51 = vpop.f32.mrb[1].mxu0  ;;  %v323_v52 = vpop.f32.mrb[1].mxu1 }
 0x117   :  { %v304_v53 = vadd.f32 %v303_v51, %v64_v46  ;;  %v324_v54 = vadd.f32 %v323_v52, %v64_v46  ;;  %v305_v55 = vpop.f32.mrb[2].mxu0  ;;  %v325_v56 = vpop.f32.mrb[2].mxu1 }
 0x118   :  { %340 = vst [vmem:[#allocation2] sm:$0xff] %v302_v49  ;;  %348 = vst [vmem:[#allocation2 + $0x40] sm:$0xff] %v322_v50  ;;  %v306_v57 = vadd.f32 %v305_v55, %v60_v45  ;;  %v326_v58 = vadd.f32 %v325_v56, %v60_v45  ;;  %v307_v59 = vpop.f32.mrb[3].mxu0  ;;  %v327_v60 = vpop.f32.mrb[3].mxu1 }
 0x119   :  { %341 = vst [vmem:[#allocation2 + $0x8] sm:$0xff] %v304_v53  ;;  %349 = vst [vmem:[#allocation2 + $0x48] sm:$0xff] %v324_v54  ;;  %v308_v61 = vadd.f32 %v307_v59, %v64_v46  ;;  %v328_v62 = vadd.f32 %v327_v60, %v64_v46 }
 0x11a   :  { %342 = vst [vmem:[#allocation2 + $0x10] sm:$0xff] %v306_v57  ;;  %350 = vst [vmem:[#allocation2 + $0x50] sm:$0xff] %v326_v58 }
 0x11b   :  { %343 = vst [vmem:[#allocation2 + $0x18] sm:$0xff] %v308_v61  ;;  %351 = vst [vmem:[#allocation2 + $0x58] sm:$0xff] %v328_v62 }
 0x11d   :  { %v311_v63 = vpop.f32.mrb[4].mxu0  ;;  %v331_v0 = vpop.f32.mrb[4].mxu1 }
 0x11e   :  { %v312_v1 = vadd.f32 %v311_v63, %v60_v45  ;;  %v332_v2 = vadd.f32 %v331_v0, %v60_v45  ;;  %v313_v3 = vpop.f32.mrb[5].mxu0  ;;  %v333_v4 = vpop.f32.mrb[5].mxu1 }
 0x11f   :  { %v314_v5 = vadd.f32 %v313_v3, %v64_v46  ;;  %v334_v6 = vadd.f32 %v333_v4, %v64_v46  ;;  %v315_v7 = vpop.f32.mrb[6].mxu0  ;;  %v335_v8 = vpop.f32.mrb[6].mxu1 }
 0x120   :  { %344 = vst [vmem:[#allocation2 + $0x20] sm:$0xff] %v312_v1  ;;  %352 = vst [vmem:[#allocation2 + $0x60] sm:$0xff] %v332_v2  ;;  %v316_v9 = vadd.f32 %v315_v7, %v60_v45  ;;  %v336_v10 = vadd.f32 %v335_v8, %v60_v45  ;;  %v317_v11 = vpop.f32.mrb[7].mxu0  ;;  %v337_v12 = vpop.f32.mrb[7].mxu1 }
 0x121   :  { %345 = vst [vmem:[#allocation2 + $0x28] sm:$0xff] %v314_v5  ;;  %353 = vst [vmem:[#allocation2 + $0x68] sm:$0xff] %v334_v6  ;;  %v318_v13 = vadd.f32 %v317_v11, %v64_v46  ;;  %v338_v14 = vadd.f32 %v337_v12, %v64_v46 }
 0x122   :  { %346 = vst [vmem:[#allocation2 + $0x30] sm:$0xff] %v316_v9  ;;  %354 = vst [vmem:[#allocation2 + $0x70] sm:$0xff] %v336_v10 }
 0x123   :  { %347 = vst [vmem:[#allocation2 + $0x38] sm:$0xff] %v318_v13  ;;  %355 = vst [vmem:[#allocation2 + $0x78] sm:$0xff] %v338_v14 }
 0x124   :  { %518 = shalt.err (!%p515_p4)
}
 0x125   :  { %s519_s15 = scalar_lea.hbm %s692_s3, 2048 }
 0x126   :  { %p520_p5 = scmp.ne.s32.totalorder %s692_s3, %s519_s15  ;;  %p523_p6 = scmp.lt.u32.totalorder %s519_s15, %s692_s3 }
 0x128   :  { %p525_p7 = pnand %p523_p6, %p520_p5 }
 0x12a   :  { %528 = shalt.err (!%p525_p7)
}
 0x12b   :  { %s532_s20 = smov 256   ;;  %s533_s21 = smov 16  }
 0x12c   :  { %367 = dma.vmem_to_hbm [thread:$0]  %s362_s2, 2048, %s692_s3, [#allocation3], %s532_s20, %s532_s20, %s533_s21  }
 0x12d   :  { %529 = dma.done.wait [#allocation3], 2048  }
 0x12e   :  { %530 = vsyncadd [#allocation3], 4294965248 }
 0x12f   :  { %371 = vsyncpa [#allocation3], 1 }

</bundles_post_ra>
